<compile_context>
chip_gen: v5e
topology: v5e:2x2
jax: 0.10.0
libtpu: 0.0.40
codegen_flags: <defaults>
</compile_context>

<pallas_src>
import jax
import jax.numpy as jnp
from jax.experimental import pallas as pl
from jax.experimental.pallas import tpu as pltpu


def _round_up(x, m):
    return ((x + m - 1) // m) * m


def moldqn_kernel(x_ref, w1_ref, b1_ref, w2_ref, b2_ref, o_ref):
    # fc1: (tb, In) @ (In, H_p) -> f32 accumulation, + f32 bias.
    h = (
        jnp.dot(x_ref[...], w1_ref[...], preferred_element_type=jnp.float32)
        + b1_ref[...]
    )
    # fc2: (tb, H_p) @ (H_p, O_p) -> f32 accumulation, + f32 bias.
    # Cast h to the weight dtype so the bf16 path runs the MXU at native bf16
    # rate; in the f32 path this cast is a no-op.
    o_ref[...] = (
        jnp.dot(h.astype(w2_ref.dtype), w2_ref[...],
                preferred_element_type=jnp.float32)
        + b2_ref[...]
    ).astype(o_ref.dtype)


def prepare_params(w1_t, b1, w2_t, b2, compute_dtype=jnp.float32):
    """Pad / cast the parameters once, outside the per-call path.

    Only the lane (output-feature) dims are padded to multiples of 128; the
    contraction dim of W1 is left at num_input so x never needs an HBM-level
    column pad.  Zero padding keeps the math exact.  Biases stay f32 (they add
    into the f32 accumulator and are negligible bytes).
    """
    num_input, H = w1_t.shape
    O = w2_t.shape[1]
    H_p = _round_up(H, 128)
    O_p = _round_up(O, 128)
    compute_dtype = jnp.dtype(compute_dtype)
    return dict(
        w1=jnp.pad(w1_t, ((0, 0), (0, H_p - H))).astype(compute_dtype),
        b1=jnp.pad(b1, ((0, 0), (0, H_p - H))).astype(jnp.float32),
        w2=jnp.pad(w2_t, ((0, H_p - H), (0, O_p - O))).astype(compute_dtype),
        b2=jnp.pad(b2, ((0, 0), (0, O_p - O))).astype(jnp.float32),
        num_input=num_input,
        num_output=O,
        compute_dtype=compute_dtype,
    )


def _pick_batch_tile(B, sublane):
    """Tile the batch: one tile for small B, else <=1024-row tiles with an
    EVEN grid-step count so v7x's two TensorCores split the grid evenly."""
    MAX_TB = 1024
    B_min = _round_up(B, sublane)
    if B_min <= MAX_TB:
        return B_min
    k = 1
    while True:
        tb = _round_up(pl.cdiv(B, 2 * k), sublane)
        if tb <= MAX_TB:
            return tb
        k += 1


def moldqn_forward(x, params):
    """MolDQN forward: fc2(fc1(x)), no activation.

    x:      (B, num_input)
    params: output of prepare_params() (padded / cast once at init time).
    """
    B, num_input = x.shape
    assert num_input == params["num_input"]
    compute_dtype = params["compute_dtype"]
    out_dtype = x.dtype

    H_p = params["w1"].shape[1]
    O_p = params["w2"].shape[1]
    num_output = params["num_output"]

    # Sub-32-bit dtypes pack along sublanes -> bf16 needs 16-row granularity.
    sublane = 8 if compute_dtype.itemsize >= 4 else (16 if compute_dtype.itemsize == 2 else 32)
    tb = _pick_batch_tile(B, sublane)
    B_p = _round_up(B, tb)
    grid = (B_p // tb,)

    # Only pad the batch dim (and only if needed); never column-pad x in HBM.
    x_in = x
    if B_p != B:
        x_in = jnp.pad(x_in, ((0, B_p - B), (0, 0)))
    if x_in.dtype != compute_dtype:
        x_in = x_in.astype(compute_dtype)

    out_p = pl.pallas_call(
        moldqn_kernel,
        out_shape=jax.ShapeDtypeStruct((B_p, O_p), out_dtype),
        grid_spec=pltpu.PrefetchScalarGridSpec(
            num_scalar_prefetch=0,
            grid=grid,
            in_specs=[
                # x batch tile: last dim == full array dim, so no 128 padding
                # needed in HBM (Mosaic lane-pads in VMEM).
                pl.BlockSpec((tb, num_input), lambda i: (i, 0)),
                pl.BlockSpec((num_input, H_p), lambda i: (0, 0)),  # W1^T (grid-invariant)
                pl.BlockSpec((1, H_p), lambda i: (0, 0)),          # b1
                pl.BlockSpec((H_p, O_p), lambda i: (0, 0)),        # W2^T (grid-invariant)
                pl.BlockSpec((1, O_p), lambda i: (0, 0)),          # b2
            ],
            out_specs=pl.BlockSpec((tb, O_p), lambda i: (i, 0)),   # lane-dense store
        ),
        compiler_params=pltpu.CompilerParams(
            dimension_semantics=("parallel",),
        ),
    )(x_in, params["w1"], params["b1"], params["w2"], params["b2"])

    # Padded rows/cols are exact zeros; slice them away.  (Downstream code that
    # can consume the padded (B_p, O_p) buffer directly may skip this copy.)
    return out_p[:B, :num_output]


def init_params(key, num_input, num_hidden, num_output, dtype=jnp.float32):
    # Mimics torch.nn.Linear default init: U(-1/sqrt(fan_in), +1/sqrt(fan_in)).
    k1, k2, k3, k4 = jax.random.split(key, 4)
    bound1 = 1.0 / (num_input ** 0.5)
    bound2 = 1.0 / (num_hidden ** 0.5)
    w1_t = jax.random.uniform(k1, (num_input, num_hidden), dtype, -bound1, bound1)
    b1 = jax.random.uniform(k2, (1, num_hidden), dtype, -bound1, bound1)
    w2_t = jax.random.uniform(k3, (num_hidden, num_output), dtype, -bound2, bound2)
    b2 = jax.random.uniform(k4, (1, num_output), dtype, -bound2, bound2)
    return w1_t, b1, w2_t, b2


if __name__ == "__main__":
    # Small shapes consistent with MolDQN's forward: x is (batch, num_input).
    batch, num_input, num_hidden, num_output = 8, 64, 32, 16

    key = jax.random.PRNGKey(0)
    kx, kp = jax.random.split(key)
    x = jax.random.normal(kx, (batch, num_input), jnp.float32)
    w1_t, b1, w2_t, b2 = init_params(kp, num_input, num_hidden, num_output)
    ref_fn = lambda xx: (xx @ w1_t + b1) @ w2_t + b2

    # f32 path (exact), single grid step.
    params_f32 = prepare_params(w1_t, b1, w2_t, b2, jnp.float32)
    out = jax.block_until_ready(moldqn_forward(x, params_f32))
    assert out.shape == (batch, num_output)
    assert jnp.allclose(out, ref_fn(x), atol=1e-5, rtol=1e-5)

    # Large-batch path: multi-step grid with an even step count (v7x megacore).
    xb = jax.random.normal(kx, (2500, num_input), jnp.float32)
    outb = jax.block_until_ready(moldqn_forward(xb, params_f32))
    assert outb.shape == (2500, num_output)
    assert jnp.allclose(outb, ref_fn(xb), atol=1e-4, rtol=1e-4)

    # bf16 compute path: half the HBM bytes, f32 MXU accumulation.
    params_bf16 = prepare_params(w1_t, b1, w2_t, b2, jnp.bfloat16)
    outh = jax.block_until_ready(moldqn_forward(x, params_bf16))
    assert outh.shape == (batch, num_output)
    assert jnp.allclose(outh, ref_fn(x), atol=5e-2, rtol=5e-2)

    print("KERNEL_OK")
</pallas_src>

<mosaic_0001>
module attributes {stable_mosaic.version = 11 : i64} {
  func.func @moldqn_kernel(%arg0: i32, %arg1: memref<8x64xf32, #tpu.memory_space<vmem>>, %arg2: memref<64x128xf32, #tpu.memory_space<vmem>>, %arg3: memref<1x128xf32, #tpu.memory_space<vmem>>, %arg4: memref<128x128xf32, #tpu.memory_space<vmem>>, %arg5: memref<1x128xf32, #tpu.memory_space<vmem>>, %arg6: memref<8x128xf32, #tpu.memory_space<vmem>>) attributes {dimension_semantics = [#tpu.dimension_semantics<parallel>], iteration_bounds = array<i64: 1>, scalar_prefetch = 0 : i64, scratch_operands = 0 : i64, tpu.core_type = #tpu.core_type<tc>, window_params = [{transform_indices = @transform_0, window_bounds = array<i64: 8, 64>}, {pipeline_mode = #tpu.pipeline_mode<synchronous>, transform_indices = @transform_1, window_bounds = array<i64: 64, 128>}, {pipeline_mode = #tpu.pipeline_mode<synchronous>, transform_indices = @transform_2, window_bounds = array<i64: 1, 128>}, {pipeline_mode = #tpu.pipeline_mode<synchronous>, transform_indices = @transform_3, window_bounds = array<i64: 128, 128>}, {pipeline_mode = #tpu.pipeline_mode<synchronous>, transform_indices = @transform_4, window_bounds = array<i64: 1, 128>}, {transform_indices = @transform_5, window_bounds = array<i64: 8, 128>}]} {
    %c0 = arith.constant 0 : index
    %c0_0 = arith.constant 0 : index
    %0 = vector.load %arg1[%c0, %c0_0] : memref<8x64xf32, #tpu.memory_space<vmem>>, vector<8x64xf32>
    %c0_1 = arith.constant 0 : index
    %c0_2 = arith.constant 0 : index
    %1 = vector.load %arg2[%c0_1, %c0_2] : memref<64x128xf32, #tpu.memory_space<vmem>>, vector<64x128xf32>
    %cst = arith.constant dense<0.000000e+00> : vector<8x128xf32>
    %2 = tpu.matmul %0, %1, %cst {dimension_numbers = #tpu.dot_dimension_numbers<[1], [0], [0], [1], [0, 0, 1, 1], [], []>} : vector<8x64xf32>, vector<64x128xf32>, vector<8x128xf32> -> vector<8x128xf32>
    %c0_3 = arith.constant 0 : index
    %c0_4 = arith.constant 0 : index
    %3 = vector.load %arg3[%c0_3, %c0_4] : memref<1x128xf32, #tpu.memory_space<vmem>>, vector<1x128xf32>
    %4 = vector.broadcast %3 : vector<1x128xf32> to vector<8x128xf32>
    %5 = arith.addf %2, %4 : vector<8x128xf32>
    %c0_5 = arith.constant 0 : index
    %c0_6 = arith.constant 0 : index
    %6 = vector.load %arg4[%c0_5, %c0_6] : memref<128x128xf32, #tpu.memory_space<vmem>>, vector<128x128xf32>
    %cst_7 = arith.constant dense<0.000000e+00> : vector<8x128xf32>
    %7 = tpu.matmul %5, %6, %cst_7 {dimension_numbers = #tpu.dot_dimension_numbers<[1], [0], [0], [1], [0, 0, 1, 1], [], []>} : vector<8x128xf32>, vector<128x128xf32>, vector<8x128xf32> -> vector<8x128xf32>
    %c0_8 = arith.constant 0 : index
    %c0_9 = arith.constant 0 : index
    %8 = vector.load %arg5[%c0_8, %c0_9] : memref<1x128xf32, #tpu.memory_space<vmem>>, vector<1x128xf32>
    %9 = vector.broadcast %8 : vector<1x128xf32> to vector<8x128xf32>
    %10 = arith.addf %7, %9 : vector<8x128xf32>
    %c0_10 = arith.constant 0 : index
    %c0_11 = arith.constant 0 : index
    %11 = vector.load %arg6[%c0_10, %c0_11] : memref<8x128xf32, #tpu.memory_space<vmem>>, vector<8x128xf32>
    tpu.vector_store %arg6[%c0_10, %c0_11], %10 {strides = array<i32>} : memref<8x128xf32, #tpu.memory_space<vmem>>, vector<8x128xf32>,
    return
  }
  func.func @transform_0(%arg0: i32) -> (i32, i32) {
    %c0_i32 = arith.constant 0 : i32
    %c0_i32_0 = arith.constant 0 : i32
    return %arg0, %c0_i32 : i32, i32
  }
  func.func @transform_1(%arg0: i32) -> (i32, i32) {
    %c0_i32 = arith.constant 0 : i32
    %c0_i32_0 = arith.constant 0 : i32
    %c0_i32_1 = arith.constant 0 : i32
    return %c0_i32, %c0_i32_0 : i32, i32
  }
  func.func @transform_2(%arg0: i32) -> (i32, i32) {
    %c0_i32 = arith.constant 0 : i32
    %c0_i32_0 = arith.constant 0 : i32
    %c0_i32_1 = arith.constant 0 : i32
    return %c0_i32, %c0_i32_0 : i32, i32
  }
  func.func @transform_3(%arg0: i32) -> (i32, i32) {
    %c0_i32 = arith.constant 0 : i32
    %c0_i32_0 = arith.constant 0 : i32
    %c0_i32_1 = arith.constant 0 : i32
    return %c0_i32, %c0_i32_0 : i32, i32
  }
  func.func @transform_4(%arg0: i32) -> (i32, i32) {
    %c0_i32 = arith.constant 0 : i32
    %c0_i32_0 = arith.constant 0 : i32
    %c0_i32_1 = arith.constant 0 : i32
    return %c0_i32, %c0_i32_0 : i32, i32
  }
  func.func @transform_5(%arg0: i32) -> (i32, i32) {
    %c0_i32 = arith.constant 0 : i32
    %c0_i32_0 = arith.constant 0 : i32
    return %arg0, %c0_i32 : i32, i32
  }
}

</mosaic_0001>

<bundles_post_ra>
// kernel: tpu_custom_call.1
= control target key start
LH: loop header
LB: loop body
LE: loop exit
PB: predicated region body
PF: predicated region fallthrough
CT: control target
= control target key end

     0   :  { %10 = vsyncpa [#allocation3], 0  ;;  %s327_s0 = inlined_call_operand.hbm [shape: f32[8,64], index: 0, kind: input, shape index: {}]   ;;  %s328_s1 = inlined_call_operand.hbm [shape: f32[64,128], index: 1, kind: input, shape index: {}]   ;;  %s329_s2 = inlined_call_operand.vmem [shape: f32[1,128], index: 2, kind: input, shape index: {}]   ;;  %s330_s3 = inlined_call_operand.hbm [shape: f32[128,128], index: 3, kind: input, shape index: {}]   ;;  %s331_s4 = inlined_call_operand.vmem [shape: f32[1,128], index: 4, kind: input, shape index: {}]   ;;  %s332_s5 = inlined_call_operand.hbm [shape: f32[8,128], index: 5, kind: output, shape index: {}]  }
   0x1   :  { %11 = vsyncpa [#allocation6], 0  ;;  %s28_s20 = sshll.u32 %s328_s1, 4  ;;  %s29_s20 = int_to_ptr.hbm [resolvable:$true] %s28_s20 }
   0x2   :  { %12 = vsyncpa [#allocation4], 0  ;;  %s273_s21 = smov [#allocation5]   ;;  %s18_s25 = sshll.u32 %s327_s0, 4  ;;  %s19_s25 = int_to_ptr.hbm [resolvable:$true] %s18_s25 }
   0x3   :  { %s30_s22 = sshll.u32 %s273_s21, 4  ;;  %s274_s26 = smov 128   ;;  %s31_s22 = int_to_ptr.vmem [resolvable:$true] %s30_s22 }
   0x4   :  { %s275_s27 = smov 8   ;;  %s276_s28 = smov [#allocation2]  }
   0x5   :  { %36 = dma.hbm_to_vmem [thread:$0]  %s29_s20, 1024, %s31_s22, [#allocation6], %s274_s26, %s274_s26, %s275_s27  }
   0x6   :  { %s20_s29 = sshll.u32 %s276_s28, 4  ;;  %s43_s7 = sshll.u32 %s330_s3, 4  ;;  %s21_s29 = int_to_ptr.vmem [resolvable:$true] %s20_s29  ;;  %s44_s7 = int_to_ptr.hbm [resolvable:$true] %s43_s7 }
   0x7   :  { %23 = dma.hbm_to_vmem [thread:$0]  %s19_s25, 128, %s21_s29, [#allocation3]  }
   0x8   :  { %s277_s1 = smov [#allocation7]  }
   0x9   :  { %s45_s8 = sshll.u32 %s277_s1, 4  ;;  %s46_s8 = int_to_ptr.vmem [resolvable:$true] %s45_s8 }
   0xa   :  { %51 = dma.hbm_to_vmem [thread:$0]  %s44_s7, 2048, %s46_s8, [#allocation6], %s274_s26, %s274_s26, %s275_s27  }
   0xb   :  { %267 = dma.done.wait [#allocation3], 128  }
   0xc   :  { %268 = vsyncadd [#allocation3], 4294967168 }
   0xd   :  { %269 = dma.done.wait [#allocation6], 3072  }
   0xe   :  { %270 = vsyncadd [#allocation6], 4294964224  ;;  %v74_v0 = vld [vmem:[#allocation5 + $0x38] sm:$0xff]  ;;  %v73_v1 = vld [vmem:[#allocation5 + $0x30] sm:$0xff]  ;;  %vm79_vm0 = vcmask 523264   ;;  %s278_s11 = smov [#allocation8]  }
   0xf   :  { %91 = vmatpush.msra.mxu0 %v74_v0  ;;  %v72_v2 = vld [vmem:[#allocation5 + $0x28] sm:$0xff]  ;;  %v118_v3 = vld [vmem:[#allocation7 + $0x78] sm:$0xff]  ;;  %v117_v4 = vld [vmem:[#allocation7 + $0x70] sm:$0xff]  ;;  %s149_s12 = sshll.u32 %s278_s11, 4  ;;  %s151_s15 = sshll.u32 %s332_s5, 4  ;;  %s150_s12 = int_to_ptr.vmem [resolvable:$true] %s149_s12  ;;  %s152_s15 = int_to_ptr.hbm [resolvable:$true] %s151_s15 }
  0x10   :  { %v71_v5 = vld [vmem:[#allocation5 + $0x20] sm:$0xff]  ;;  %123 = vmatpush.msra.mxu1 %v118_v3  ;;  %v116_v6 = vld [vmem:[#allocation7 + $0x68] sm:$0xff]  ;;  %v70_v7 = vld [vmem:[#allocation5 + $0x18] sm:$0xff] }
  0x11   :  { %92 = vmatpush.msra.mxu0 %v73_v1  ;;  %v115_v8 = vld [vmem:[#allocation7 + $0x60] sm:$0xff]  ;;  %v69_v9 = vld [vmem:[#allocation5 + $0x10] sm:$0xff]  ;;  %v114_v10 = vld [vmem:[#allocation7 + $0x58] sm:$0xff] }
  0x12   :  { %124 = vmatpush.msra.mxu1 %v117_v4  ;;  %v68_v11 = vld [vmem:[#allocation5 + $0x8] sm:$0xff]  ;;  %v113_v12 = vld [vmem:[#allocation7 + $0x50] sm:$0xff]  ;;  %v67_v13 = vld [vmem:[#allocation5] sm:$0xff] }
  0x13   :  { %93 = vmatpush.msra.mxu0 %v72_v2  ;;  %v66_v14 = vld [vmem:[#allocation2] sm:$0xff]  ;;  %v112_v15 = vld [vmem:[#allocation7 + $0x48] sm:$0xff]  ;;  %v111_v16 = vld [vmem:[#allocation7 + $0x40] sm:$0xff] }
  0x14   :  { %125 = vmatpush.msra.mxu1 %v116_v6  ;;  %v110_v17 = vld [vmem:[#allocation7 + $0x38] sm:$0xff]  ;;  %v109_v18 = vld [vmem:[#allocation7 + $0x30] sm:$0xff]  ;;  %v108_v19 = vld [vmem:[#allocation7 + $0x28] sm:$0xff] }
  0x15   :  { %94 = vmatpush.msra.mxu0 %v71_v5  ;;  %v107_v20 = vld [vmem:[#allocation7 + $0x20] sm:$0xff]  ;;  %v106_v21 = vld [vmem:[#allocation7 + $0x18] sm:$0xff]  ;;  %v105_v22 = vld [vmem:[#allocation7 + $0x10] sm:$0xff] }
  0x16   :  { %126 = vmatpush.msra.mxu1 %v115_v8  ;;  %v104_v23 = vld [vmem:[#allocation7 + $0x8] sm:$0xff]  ;;  %v103_v24 = vld [vmem:[#allocation7] sm:$0xff]  ;;  %v169_v25 = vld [vmem:[%s329_s2] ss:$0 sm:$0xff] }
  0x17   :  { %95 = vmatpush.msra.mxu0 %v70_v7  ;;  %v170_v28 = vld [vmem:[%s331_s4] ss:$0 sm:$0xff] }
  0x18   :  { %127 = vmatpush.msra.mxu1 %v114_v10 }
  0x19   :  { %96 = vmatpush.msra.mxu0 %v69_v9 }
  0x1a   :  { %128 = vmatpush.msra.mxu1 %v113_v12 }
  0x1b   :  { %97 = vmatpush.msra.mxu0 %v68_v11 }
  0x1c   :  { %129 = vmatpush.msra.mxu1 %v112_v15 }
  0x1d   :  { %98 = vmatpush.msra.mxu0 %v67_v13 }
  0x1e   :  { %162 = vmatmul.msk.f32.vlgmr.msra.gmra.mxu0 %vm79_vm0, %v66_v14  ;;  %130 = vmatpush.msra.mxu1 %v111_v16 }
  0x20   :  { %131 = vmatpush.msra.mxu1 %v110_v17 }
  0x22   :  { %132 = vmatpush.msra.mxu1 %v109_v18 }
  0x24   :  { %133 = vmatpush.msra.mxu1 %v108_v19 }
  0x26   :  { %134 = vmatpush.msra.mxu1 %v107_v20 }
  0x28   :  { %135 = vmatpush.msra.mxu1 %v106_v21 }
  0x2a   :  { %136 = vmatpush.msra.mxu1 %v105_v22 }
  0x2c   :  { %137 = vmatpush.msra.mxu1 %v104_v23 }
  0x2e   :  { %138 = vmatpush.msra.mxu1 %v103_v24 }
  0x9b   :  { %v100_v26 = vpop.f32.mrf.mxu0 }
  0x9c   :  { %v101_v27 = vadd.f32 %v169_v25, %v100_v26 }
  0x9e   :  { %139 = vmatmul.f32.vlgmr.msra.gmra.mxu1 %v101_v27 }
 0x11b   :  { %v140_v29 = vpop.f32.mrf.mxu1 }
 0x11c   :  { %v141_v30 = vadd.f32 %v170_v28, %v140_v29 }
 0x11e   :  { %143 = vst [vmem:[#allocation8] sm:$0xff] %v141_v30 }
 0x11f   :  { %154 = dma.vmem_to_hbm [thread:$0]  %s150_s12, 128, %s152_s15, [#allocation4]  }
 0x120   :  { %271 = dma.done.wait [#allocation4], 128  }
 0x121   :  { %272 = vsyncadd [#allocation4], 4294967168 }
 0x122   :  { %159 = vsyncpa [#allocation3], 1 }
 0x123   :  { %160 = vsyncpa [#allocation6], 1 }
 0x124   :  { %161 = vsyncpa [#allocation4], 1 }

</bundles_post_ra>
